<compile_context>
chip_gen: v7x
topology: tpu7x:2x2x1
jax: 0.10.0
libtpu: 0.0.40
codegen_flags: <defaults>
</compile_context>

<pallas_src>
import functools

import numpy as np
import jax
import jax.numpy as jnp
from jax.experimental import pallas as pl
from jax.experimental.pallas import tpu as pltpu


def _tritovec_kernel(x_ref, o_ref, *, D):
    # x_ref: (tb, D*D) flattened input tile
    # o_ref: (tb, N)   upper-triangular entries, row-major order
    #
    # Static, fully-unrolled ref->ref slice copies.  Each statement is a
    # streaming copy (vld -> lane shift -> vst per vreg), so there is never a
    # multi-MB live value held against the 64-vreg register file.
    off = 0
    for r in range(D):
        w = D - r
        o_ref[:, off:off + w] = x_ref[:, r * D + r:r * D + D]
        off += w


# Total working-set budget: double-buffered input tile + double-buffered
# output tile.  24 MiB leaves headroom under the explicit 32 MiB scoped-VMEM
# limit below on every generation (v5e/v6e: 128 MiB physical, v7x: 64 MiB).
_VMEM_BUDGET_BYTES = 24 * 1024 * 1024


def _pick_block_b(B, D, itemsize):
    """Choose the batch tile size tb and the scoped-VMEM limit.

    tb is the sublane axis of both the (tb, D*D) input tile and the (tb, N)
    output tile, so it is rounded to the dtype's native sublane packing
    (8 for 4-byte, 16 for 2-byte, 32 for 1-byte types).  It is sized to fill
    the VMEM budget -- no artificial cap: each grid step costs ~0.35 us, so
    for small D / large B, big batch tiles are what keeps the kernel at the
    HBM roofline.
    """
    N = D * (D + 1) // 2
    sub = max(8, 32 // itemsize)                      # dtype-aware sublane multiple
    per_row = 2 * (D * D + N) * itemsize              # in + out, double-buffered
    tb = max(sub, (_VMEM_BUDGET_BYTES // per_row) // sub * sub)
    if tb >= B:
        tb = B                                        # one block covers the batch

    working = per_row * tb
    # Explicit scoped-VMEM limit: 32 MiB matches the v6e/v7x defaults and lifts
    # v5e's 16 MiB default so the budgeted tile always compiles.  For very
    # large D the tb floor can exceed the budget; bump the limit with headroom
    # (a row-block grid axis would be the proper fix for D >~ 700 at f32).
    vmem_limit = max(32 * 1024 * 1024,
                     min(int(working * 1.25) + (1 << 20), 56 * 1024 * 1024))
    return tb, vmem_limit


def tritovec(x):
    """x: (B, D, D) -> (B, D*(D+1)//2, 1), matching PyTorch tritovec exactly."""
    B, D, D2 = x.shape
    assert D == D2, "tritovec expects square matrices (B, D, D)"
    N = D * (D + 1) // 2

    tb, vmem_limit = _pick_block_b(B, D, x.dtype.itemsize)
    grid = (pl.cdiv(B, tb),)

    # Trailing-dims row-major reshape: free in XLA (no HBM relayout copy), and
    # it makes the lane axis D*D wide -> dense VMEM tiles + contiguous DMAs.
    x_flat = x.reshape(B, D * D)

    out = pl.pallas_call(
        functools.partial(_tritovec_kernel, D=D),
        out_shape=jax.ShapeDtypeStruct((B, N), x.dtype),
        grid=grid,
        in_specs=[pl.BlockSpec((tb, D * D), lambda b: (b, 0))],
        out_specs=pl.BlockSpec((tb, N), lambda b: (b, 0)),
        compiler_params=pltpu.CompilerParams(
            dimension_semantics=("parallel",),
            vmem_limit_bytes=vmem_limit),
    )(x_flat)

    # PyTorch's x[:, index] with index of shape (N, 1) yields (B, N, 1).
    return out[:, :, None]


if __name__ == "__main__":
    key = jax.random.PRNGKey(0)
    B, D = 2, 8  # small shapes: batch=2, dim=8 (tiny covariance-style matrix)
    x = jax.random.normal(key, (B, D, D), dtype=jnp.float32)

    y = jax.block_until_ready(tritovec(x))

    # Host-side reference: static triu gather built with numpy.
    mask = np.triu(np.ones((D, D), np.float32)).reshape(D * D)
    idx = np.nonzero(mask)[0]
    y_ref = np.asarray(x).reshape(B, D * D)[:, idx][:, :, None]

    assert y.shape == (B, D * (D + 1) // 2, 1)
    assert np.array_equal(np.asarray(y), y_ref)  # pure copies => bit-exact

    print("KERNEL_OK")
</pallas_src>

<mosaic_0001>
module attributes {stable_mosaic.version = 11 : i64} {
  func.func @_tritovec_kernel(%arg0: i32, %arg1: memref<2x64xf32, #tpu.memory_space<vmem>>, %arg2: memref<2x36xf32, #tpu.memory_space<vmem>>) attributes {dimension_semantics = [#tpu.dimension_semantics<parallel>], iteration_bounds = array<i64: 1>, scalar_prefetch = 0 : i64, scratch_operands = 0 : i64, tpu.core_type = #tpu.core_type<tc>, window_params = [{transform_indices = @transform_0, window_bounds = array<i64: 2, 64>}, {transform_indices = @transform_1, window_bounds = array<i64: 2, 36>}]} {
    %c0 = arith.constant 0 : index
    %c0_0 = arith.constant 0 : index
    %0 = vector.load %arg1[%c0, %c0_0] : memref<2x64xf32, #tpu.memory_space<vmem>>, vector<2x8xf32>
    %c0_1 = arith.constant 0 : index
    %c0_2 = arith.constant 0 : index
    %1 = vector.load %arg2[%c0_1, %c0_2] : memref<2x36xf32, #tpu.memory_space<vmem>>, vector<2x8xf32>
    tpu.vector_store %arg2[%c0_1, %c0_2], %0 {strides = array<i32>} : memref<2x36xf32, #tpu.memory_space<vmem>>, vector<2x8xf32>,
    %c0_3 = arith.constant 0 : index
    %c9 = arith.constant 9 : index
    %2 = vector.load %arg1[%c0_3, %c9] : memref<2x64xf32, #tpu.memory_space<vmem>>, vector<2x7xf32>
    %c0_4 = arith.constant 0 : index
    %c8 = arith.constant 8 : index
    %3 = vector.load %arg2[%c0_4, %c8] : memref<2x36xf32, #tpu.memory_space<vmem>>, vector<2x7xf32>
    tpu.vector_store %arg2[%c0_4, %c8], %2 {strides = array<i32>} : memref<2x36xf32, #tpu.memory_space<vmem>>, vector<2x7xf32>,
    %c0_5 = arith.constant 0 : index
    %c18 = arith.constant 18 : index
    %4 = vector.load %arg1[%c0_5, %c18] : memref<2x64xf32, #tpu.memory_space<vmem>>, vector<2x6xf32>
    %c0_6 = arith.constant 0 : index
    %c15 = arith.constant 15 : index
    %5 = vector.load %arg2[%c0_6, %c15] : memref<2x36xf32, #tpu.memory_space<vmem>>, vector<2x6xf32>
    tpu.vector_store %arg2[%c0_6, %c15], %4 {strides = array<i32>} : memref<2x36xf32, #tpu.memory_space<vmem>>, vector<2x6xf32>,
    %c0_7 = arith.constant 0 : index
    %c27 = arith.constant 27 : index
    %6 = vector.load %arg1[%c0_7, %c27] : memref<2x64xf32, #tpu.memory_space<vmem>>, vector<2x5xf32>
    %c0_8 = arith.constant 0 : index
    %c21 = arith.constant 21 : index
    %7 = vector.load %arg2[%c0_8, %c21] : memref<2x36xf32, #tpu.memory_space<vmem>>, vector<2x5xf32>
    tpu.vector_store %arg2[%c0_8, %c21], %6 {strides = array<i32>} : memref<2x36xf32, #tpu.memory_space<vmem>>, vector<2x5xf32>,
    %c0_9 = arith.constant 0 : index
    %c36 = arith.constant 36 : index
    %8 = vector.load %arg1[%c0_9, %c36] : memref<2x64xf32, #tpu.memory_space<vmem>>, vector<2x4xf32>
    %c0_10 = arith.constant 0 : index
    %c26 = arith.constant 26 : index
    %9 = vector.load %arg2[%c0_10, %c26] : memref<2x36xf32, #tpu.memory_space<vmem>>, vector<2x4xf32>
    tpu.vector_store %arg2[%c0_10, %c26], %8 {strides = array<i32>} : memref<2x36xf32, #tpu.memory_space<vmem>>, vector<2x4xf32>,
    %c0_11 = arith.constant 0 : index
    %c45 = arith.constant 45 : index
    %10 = vector.load %arg1[%c0_11, %c45] : memref<2x64xf32, #tpu.memory_space<vmem>>, vector<2x3xf32>
    %c0_12 = arith.constant 0 : index
    %c30 = arith.constant 30 : index
    %11 = vector.load %arg2[%c0_12, %c30] : memref<2x36xf32, #tpu.memory_space<vmem>>, vector<2x3xf32>
    tpu.vector_store %arg2[%c0_12, %c30], %10 {strides = array<i32>} : memref<2x36xf32, #tpu.memory_space<vmem>>, vector<2x3xf32>,
    %c0_13 = arith.constant 0 : index
    %c54 = arith.constant 54 : index
    %12 = vector.load %arg1[%c0_13, %c54] : memref<2x64xf32, #tpu.memory_space<vmem>>, vector<2x2xf32>
    %c0_14 = arith.constant 0 : index
    %c33 = arith.constant 33 : index
    %13 = vector.load %arg2[%c0_14, %c33] : memref<2x36xf32, #tpu.memory_space<vmem>>, vector<2x2xf32>
    tpu.vector_store %arg2[%c0_14, %c33], %12 {strides = array<i32>} : memref<2x36xf32, #tpu.memory_space<vmem>>, vector<2x2xf32>,
    %c0_15 = arith.constant 0 : index
    %c63 = arith.constant 63 : index
    %14 = vector.load %arg1[%c0_15, %c63] : memref<2x64xf32, #tpu.memory_space<vmem>>, vector<2x1xf32>
    %c0_16 = arith.constant 0 : index
    %c35 = arith.constant 35 : index
    %15 = vector.load %arg2[%c0_16, %c35] : memref<2x36xf32, #tpu.memory_space<vmem>>, vector<2x1xf32>
    tpu.vector_store %arg2[%c0_16, %c35], %14 {strides = array<i32>} : memref<2x36xf32, #tpu.memory_space<vmem>>, vector<2x1xf32>,
    return
  }
  func.func @transform_0(%arg0: i32) -> (i32, i32) {
    %c0_i32 = arith.constant 0 : i32
    %c0_i32_0 = arith.constant 0 : i32
    return %arg0, %c0_i32 : i32, i32
  }
  func.func @transform_1(%arg0: i32) -> (i32, i32) {
    %c0_i32 = arith.constant 0 : i32
    %c0_i32_0 = arith.constant 0 : i32
    return %arg0, %c0_i32 : i32, i32
  }
}

</mosaic_0001>

<bundles_post_ra>
// kernel: tpu_custom_call.1
= control target key start
LH: loop header
LB: loop body
LE: loop exit
PB: predicated region body
PF: predicated region fallthrough
CT: control target
= control target key end

     0   :  { %6 = vsyncpa [#allocation3], 0  ;;  %s188_s0 = inlined_call_operand.hbm [shape: f32[2,64], index: 0, kind: input, shape index: {}]   ;;  %s189_s1 = inlined_call_operand.hbm [shape: f32[2,36], index: 1, kind: output, shape index: {}]  }
   0x1   :  { %7 = vsyncpa [#allocation4], 0  ;;  %s145_s6 = smov [#allocation2]   ;;  %s97_s10 = scalar_lea.hbm %s188_s0, 32 }
   0x2   :  { %s14_s7 = sshll.u32 %s145_s6, 4  ;;  %p98_p0 = scmp.ne.s32.totalorder %s188_s0, %s97_s10  ;;  %s15_s7 = int_to_ptr.vmem [resolvable:$true] %s14_s7 }
   0x3   :  { %p101_p1 = scmp.lt.u32.totalorder %s97_s10, %s188_s0 }
   0x5   :  { %p103_p2 = pnand %p101_p1, %p98_p0 }
   0x7   :  { %106 = shalt.err (!%p103_p2)
}
   0x8   :  { %s107_s15 = scalar_lea.vmem %s15_s7, 32  ;;  %p112_p4 = scmp.lt.s32.totalorder %s15_s7, %s15_s7 }
   0x9   :  { %p108_p3 = scmp.ne.s32.totalorder %s15_s7, %s107_s15  ;;  %p113_p5 = scmp.lt.s32.totalorder %s107_s15, %s107_s15 }
   0xb   :  { %p114_p6 = por %p113_p5, %p112_p4 }
   0xd   :  { %p115_p7 = pnand %p114_p6, %p108_p3 }
   0xf   :  { %118 = shalt.err (!%p115_p7)
}
  0x10   :  { %17 = dma.hbm_to_vmem [thread:$0]  %s188_s0, 32, %s15_s7, [#allocation3]  }
  0x11   :  { %141 = dma.done.wait [#allocation3], 32  }
  0x12   :  { %142 = vsyncadd [#allocation3], 4294967264  ;;  %v24_v0 = vld [vmem:[#allocation2] sm:$0x3]  ;;  %vm22_vm0 = vcmask 58368   ;;  %s146_s18 = smov 127  }
  0x13   :  { %v38_v1 = vld [vmem:[#allocation2] sm:$0x3]  ;;  %26 = vrot.lane.b32.xlu0 %v24_v0, %s146_s18  ;;  %s147_s19 = smov 122   ;;  %s148_s20 = smov 125   ;;  %vm29_vm1 = vcmask 115776   ;;  %vm36_vm2 = vcmask 164984  }
  0x14   :  { %40 = vrot.lane.b32.xlu1 %v38_v1, %s147_s19  ;;  %v31_v2 = vld [vmem:[#allocation2] sm:$0x3]  ;;  %s149_s21 = smov 118   ;;  %s150_s0 = smov 113   ;;  %vm43_vm3 = vcmask 205992   ;;  %vm50_vm4 = vcmask 238800  }
  0x15   :  { %v45_v3 = vld [vmem:[#allocation2] sm:$0x3]  ;;  %s151_s22 = smov 107   ;;  %s152_s23 = smov 100   ;;  %vm57_vm5 = vcmask 263408   ;;  %vm64_vm6 = vcmask 279816  }
  0x16   :  { %v21_v4 = vld [vmem:[#allocation2] sm:$0x3]  ;;  %s153_s24 = smov [#allocation5]   ;;  %vm71_vm7 = vcmask 288024  }
  0x17   :  { %23 = vst.msk [vmem:[#allocation5] sm:$0x3] %vm22_vm0, %v21_v4  ;;  %33 = vrot.lane.b32.xlu0 %v31_v2, %s148_s20  ;;  %v52_v5 = vld [vmem:[#allocation2] sm:$0x3]  ;;  %s79_s25 = sshll.u32 %s153_s24, 4  ;;  %s80_s25 = int_to_ptr.vmem [resolvable:$true] %s79_s25 }
  0x18   :  { %47 = vrot.lane.b32.xlu1 %v45_v3, %s149_s21  ;;  %v59_v6 = vld [vmem:[#allocation2] sm:$0x3]  ;;  %s119_s26 = scalar_lea.vmem %s80_s25, 32  ;;  %p124_p9 = scmp.lt.s32.totalorder %s80_s25, %s80_s25 }
  0x19   :  { %v66_v7 = vld [vmem:[#allocation2] sm:$0x3]  ;;  %p120_p8 = scmp.ne.s32.totalorder %s80_s25, %s119_s26  ;;  %p125_p10 = scmp.lt.s32.totalorder %s119_s26, %s119_s26 }
  0x1b   :  { %54 = vrot.lane.b32.xlu0 %v52_v5, %s150_s0  ;;  %p126_p11 = por %p125_p10, %p124_p9 }
  0x1c   :  { %61 = vrot.lane.b32.xlu1 %v59_v6, %s151_s22 }
  0x1d   :  { %p127_p12 = pnand %p126_p11, %p120_p8 }
  0x1f   :  { %68 = vrot.lane.b32.xlu0 %v66_v7, %s152_s23 }
  0x85   :  { %v27_v8 = vpop.permute.xlu0 %26 }
  0x86   :  { %v41_v9 = vpop.permute.xlu1 %40  ;;  %30 = vst.msk [vmem:[#allocation5] sm:$0x3] %vm29_vm1, %v27_v8 }
  0x89   :  { %v34_v10 = vpop.permute.xlu0 %33 }
  0x8a   :  { %v48_v11 = vpop.permute.xlu1 %47  ;;  %37 = vst.msk [vmem:[#allocation5] sm:$0x3] %vm36_vm2, %v34_v10 }
  0x8b   :  { %44 = vst.msk [vmem:[#allocation5] sm:$0x3] %vm43_vm3, %v41_v9 }
  0x8c   :  { %51 = vst.msk [vmem:[#allocation5] sm:$0x3] %vm50_vm4, %v48_v11 }
  0x8d   :  { %v55_v12 = vpop.permute.xlu0 %54 }
  0x8e   :  { %v62_v13 = vpop.permute.xlu1 %61  ;;  %58 = vst.msk [vmem:[#allocation5] sm:$0x3] %vm57_vm5, %v55_v12 }
  0x8f   :  { %65 = vst.msk [vmem:[#allocation5] sm:$0x3] %vm64_vm6, %v62_v13 }
  0x91   :  { %v69_v14 = vpop.permute.xlu0 %68 }
  0x92   :  { %72 = vst.msk [vmem:[#allocation5] sm:$0x3] %vm71_vm7, %v69_v14 }
  0x93   :  { %130 = shalt.err (!%p127_p12)
}
  0x94   :  { %s131_s29 = scalar_lea.hbm %s189_s1, 32 }
  0x95   :  { %p132_p13 = scmp.ne.s32.totalorder %s189_s1, %s131_s29  ;;  %p135_p0 = scmp.lt.u32.totalorder %s131_s29, %s189_s1 }
  0x97   :  { %p137_p1 = pnand %p135_p0, %p132_p13 }
  0x99   :  { %140 = shalt.err (!%p137_p1)
}
  0x9a   :  { %82 = dma.vmem_to_hbm [thread:$0]  %s80_s25, 32, %s189_s1, [#allocation4]  }
  0x9b   :  { %143 = dma.done.wait [#allocation4], 32  }
  0x9c   :  { %144 = vsyncadd [#allocation4], 4294967264 }
  0x9d   :  { %86 = vsyncpa [#allocation3], 1 }
  0x9e   :  { %87 = vsyncpa [#allocation4], 1 }

</bundles_post_ra>
